<compile_context>
chip_gen: v7x
topology: tpu7x:2x2x1
jax: 0.10.0
libtpu: 0.0.40
codegen_flags: <defaults>
</compile_context>

<pallas_src>
import functools
import math

import jax
import jax.numpy as jnp
from jax.experimental import pallas as pl
from jax.experimental.pallas import tpu as pltpu


# ----------------------------------------------------------------------------
# Plain-JAX helpers (module setup / glue, not the hot path).
# ----------------------------------------------------------------------------
def create_sin_cos_encoding(d_model, max_seq_length, dtype=jnp.float32):
    position = jnp.arange(max_seq_length, dtype=dtype)[:, None]            # (L, 1)
    div_term = jnp.exp(
        jnp.arange(0, d_model, 2, dtype=dtype) * (-(math.log(10000.0) / d_model)))
    pe = jnp.zeros((max_seq_length, d_model), dtype=dtype)
    pe = pe.at[:, 0::2].set(jnp.sin(position * div_term))
    pe = pe.at[:, 1::2].set(jnp.cos(position * div_term))
    return pe                                                              # (L, D)


# ----------------------------------------------------------------------------
# Fused kernels: x + pos_pe + (mask ? pe[steps[b]] : pe[steps[b]]) -> LayerNorm.
# All math in f32, cast once on store.
# ----------------------------------------------------------------------------
def _second_masked_kernel(x_ref, pos_ref, step_ref, mask_ref, g_ref, b_ref, o_ref,
                          *, eps):
    h = x_ref[...].astype(jnp.float32) + pos_ref[...].astype(jnp.float32)
    step_row = step_ref[...].astype(jnp.float32)                 # (tb, 1, D)
    h = h + jnp.where(mask_ref[...] != 0, step_row, 0.0)         # (tb, ts, D)
    mean = jnp.mean(h, axis=-1, keepdims=True)
    var = jnp.mean(jnp.square(h - mean), axis=-1, keepdims=True)
    hn = (h - mean) * jax.lax.rsqrt(var + eps)
    y = hn * g_ref[...].astype(jnp.float32) + b_ref[...].astype(jnp.float32)
    o_ref[...] = y.astype(o_ref.dtype)


def _second_nomask_kernel(x_ref, pos_ref, step_ref, g_ref, b_ref, o_ref, *, eps):
    h = x_ref[...].astype(jnp.float32) + pos_ref[...].astype(jnp.float32)
    h = h + step_ref[...].astype(jnp.float32)
    mean = jnp.mean(h, axis=-1, keepdims=True)
    var = jnp.mean(jnp.square(h - mean), axis=-1, keepdims=True)
    hn = (h - mean) * jax.lax.rsqrt(var + eps)
    y = hn * g_ref[...].astype(jnp.float32) + b_ref[...].astype(jnp.float32)
    o_ref[...] = y.astype(o_ref.dtype)


# ----------------------------------------------------------------------------
# Tile / VMEM sizing.
# ----------------------------------------------------------------------------
def _dtype_pack(itemsize):
    return {4: 8, 2: 16, 1: 32}.get(itemsize, 8)


def _vmem_budget_bytes():
    try:
        cap = int(pltpu.get_tpu_info().vmem_capacity_bytes)
    except Exception:
        cap = 64 << 20          # conservative fallback (v7x per-core VMEM)
    return (cap * 3) // 4


def _pick_tiles(B, S, D, itemsize, mask_present, budget):
    """~4 MiB slabs (generation-capped), sublane-pack rounded, >=2 grid blocks."""
    target = min(4 << 20, budget // 12)        # headroom for x/out/pos double-buffers
    pack = _dtype_pack(itemsize)
    if mask_present:
        pack = max(pack, 32)                    # int8 mask shares the sublane (seq) axis
    row_bytes = max(D * itemsize, 1)

    ts = max(target // row_bytes, 1)
    if ts >= S:
        ts = S                                  # full-dim block is always legal
    else:
        ts = max((ts // pack) * pack, min(pack, S))

    tb = 1
    if ts >= S:                                 # whole sequence fits -> batch-tile too
        tb = min(B, max(1, target // max(S * row_bytes, 1)))
        while B % tb:                           # keep batch blocks exact
            tb -= 1

    def nblocks(tb_, ts_):
        return pl.cdiv(B, tb_) * pl.cdiv(S, ts_)

    # v7x has 2 TensorCores: ensure >=2 "parallel" blocks whenever the shape allows.
    if nblocks(tb, ts) < 2:
        if tb > 1:
            tb = max(1, tb // 2)
            while B % tb:
                tb -= 1
        elif B == 1 and ts >= S and S > pack:
            half = ((S + 1) // 2 + pack - 1) // pack * pack
            if half < S:
                ts = half
    return tb, ts


# ----------------------------------------------------------------------------
# EmbeddingBlockSecond.forward — fused Pallas call.
# ----------------------------------------------------------------------------
def embedding_block_second(x, steps, *, pos_pe, step_pe, gamma, beta,
                           mask=None, eps=1e-5):
    """x:(B,S,D) float, steps:(B,) int, pos_pe:(L>=S,D), step_pe:(max_steps,D),
    gamma/beta:(D,), mask: optional (B,S) bool.  Dropout applied as identity."""
    B, S, D = x.shape
    assert S <= pos_pe.shape[0], "sequence longer than positional-encoding table"
    steps = steps.astype(jnp.int32)
    itemsize = jnp.dtype(x.dtype).itemsize

    budget = _vmem_budget_bytes()
    tb, ts = _pick_tiles(B, S, D, itemsize, mask is not None, budget)
    # batch innermost: pos tile index ignores the batch axis -> fetched once per seq tile.
    grid = (pl.cdiv(S, ts), pl.cdiv(B, tb))

    pos = pos_pe[:S].astype(jnp.float32).reshape(1, S, D)
    step_rows = step_pe.astype(jnp.float32)[steps].reshape(B, 1, D)   # pre-gathered pe[steps]
    g = gamma.astype(jnp.float32).reshape(1, 1, D)
    b = beta.astype(jnp.float32).reshape(1, 1, D)

    x_spec = pl.BlockSpec((tb, ts, D), lambda s, bi: (bi, s, 0))
    pos_spec = pl.BlockSpec((1, ts, D), lambda s, bi: (0, s, 0))
    step_spec = pl.BlockSpec((tb, 1, D), lambda s, bi: (bi, 0, 0))
    gb_spec = pl.BlockSpec((1, 1, D), lambda s, bi: (0, 0, 0))
    out_spec = pl.BlockSpec((tb, ts, D), lambda s, bi: (bi, s, 0))

    blk = tb * ts * D * itemsize
    vmem_needed = 2 * (2 * blk + ts * D * 4 + tb * D * 4 + 2 * D * 4 + tb * ts)
    vmem_limit = int(min(max(vmem_needed + (8 << 20), 32 << 20), budget))
    cparams = pltpu.CompilerParams(
        dimension_semantics=("parallel", "parallel"),
        vmem_limit_bytes=vmem_limit)

    out_shape = jax.ShapeDtypeStruct((B, S, D), x.dtype)

    if mask is None:
        kernel = functools.partial(_second_nomask_kernel, eps=float(eps))
        return pl.pallas_call(
            kernel, out_shape=out_shape, grid=grid,
            in_specs=[x_spec, pos_spec, step_spec, gb_spec, gb_spec],
            out_specs=out_spec, compiler_params=cparams,
        )(x, pos, step_rows, g, b)

    mask_i8 = mask.astype(jnp.int8).reshape(B, S, 1)   # 1 byte/elem; no f32 mask materialization
    mask_spec = pl.BlockSpec((tb, ts, 1), lambda s, bi: (bi, s, 0))
    kernel = functools.partial(_second_masked_kernel, eps=float(eps))
    return pl.pallas_call(
        kernel, out_shape=out_shape, grid=grid,
        in_specs=[x_spec, pos_spec, step_spec, mask_spec, gb_spec, gb_spec],
        out_specs=out_spec, compiler_params=cparams,
    )(x, pos, step_rows, mask_i8, g, b)


# ----------------------------------------------------------------------------
# EmbeddingBlockFirst.forward + full EmbeddingBlock.forward (wrapper glue).
# ----------------------------------------------------------------------------
def embedding_block_first(token_ids, steps, mask, *, embedding_table, max_steps,
                          noise_key):
    # TODO(synk): nn.Embedding gather + MaskedForwardDiffusion (gaussian noise) are
    # kept in plain JAX; only EmbeddingBlockSecond is fused into the Pallas kernel.
    x = jnp.take(embedding_table, token_ids, axis=0)                     # (B, S, D)
    noise = jax.random.normal(noise_key, x.shape, x.dtype)               # randn_like
    ni = 1.0 - steps.astype(x.dtype) / jnp.asarray(max_steps, x.dtype)   # (B,)
    ni = 1.0 - jnp.cos(jnp.pi * ni / 2.0)
    ni = ni[:, None, None]
    x_diff = x * ni + noise * (1.0 - ni)
    return jnp.where(mask[..., None], x_diff, x)


def embedding_block(token_ids, steps, mask, *, embedding_table, max_steps,
                    pos_pe, step_pe, gamma, beta, noise_key, eps=1e-5):
    x = embedding_block_first(token_ids, steps, mask, embedding_table=embedding_table,
                              max_steps=max_steps, noise_key=noise_key)
    # TODO(synk): nn.Dropout is stochastic; applied as identity (eval mode) here.
    return embedding_block_second(x, steps, pos_pe=pos_pe, step_pe=step_pe,
                                  gamma=gamma, beta=beta, mask=mask, eps=eps)


# ----------------------------------------------------------------------------
# Pure-JAX reference for the fused second block.
# ----------------------------------------------------------------------------
def embedding_block_second_reference(x, steps, mask, pos_pe, step_pe, gamma, beta,
                                     eps=1e-5):
    B, S, D = x.shape
    h = x.astype(jnp.float32) + pos_pe[:S].astype(jnp.float32)[None]
    step_rows = step_pe.astype(jnp.float32)[steps][:, None, :]
    if mask is None:
        h = h + step_rows
    else:
        h = h + jnp.where(mask[..., None], step_rows, 0.0)
    mean = jnp.mean(h, axis=-1, keepdims=True)
    var = jnp.mean(jnp.square(h - mean), axis=-1, keepdims=True)
    y = (h - mean) / jnp.sqrt(var + eps) * gamma.astype(jnp.float32) \
        + beta.astype(jnp.float32)
    return y.astype(x.dtype)


if __name__ == "__main__":
    vocab_size, d_model, pad_idx, max_steps = 32, 128, 0, 64   # D multiple of 128 -> lane-dense
    batch, seq = 2, 16

    key = jax.random.PRNGKey(0)
    k_emb, k_tok, k_step, k_mask, k_noise, k_g, k_b = jax.random.split(key, 7)

    emb_table = jax.random.normal(k_emb, (vocab_size, d_model), jnp.float32)
    emb_table = emb_table.at[pad_idx].set(0.0)                  # padding_idx row
    tokens = jax.random.randint(k_tok, (batch, seq), 0, vocab_size, dtype=jnp.int32)
    steps = jax.random.randint(k_step, (batch,), 0, max_steps, dtype=jnp.int32)
    mask = jax.random.bernoulli(k_mask, 0.5, (batch, seq))

    pos_pe = create_sin_cos_encoding(d_model, 512)              # PositionalEncoding buffer
    step_pe = create_sin_cos_encoding(d_model, max_steps)       # StepEncoding buffer
    gamma = 1.0 + 0.1 * jax.random.normal(k_g, (d_model,), jnp.float32)
    beta = 0.1 * jax.random.normal(k_b, (d_model,), jnp.float32)

    # Full EmbeddingBlock forward (first block in XLA, second block fused in Pallas).
    x_first = embedding_block_first(tokens, steps, mask, embedding_table=emb_table,
                                    max_steps=max_steps, noise_key=k_noise)
    out = embedding_block(tokens, steps, mask, embedding_table=emb_table,
                          max_steps=max_steps, pos_pe=pos_pe, step_pe=step_pe,
                          gamma=gamma, beta=beta, noise_key=k_noise)
    out = jax.block_until_ready(out)
    ref = embedding_block_second_reference(x_first, steps, mask, pos_pe, step_pe,
                                           gamma, beta)
    assert out.shape == (batch, seq, d_model)
    assert jnp.allclose(out, ref, atol=1e-4, rtol=1e-4), "masked fused kernel mismatch"

    # StepEncoding(mask=None) path of the fused kernel.
    out_nm = embedding_block_second(x_first, steps, pos_pe=pos_pe, step_pe=step_pe,
                                    gamma=gamma, beta=beta, mask=None)
    jax.block_until_ready(out_nm)
    ref_nm = embedding_block_second_reference(x_first, steps, None, pos_pe, step_pe,
                                              gamma, beta)
    assert jnp.allclose(out_nm, ref_nm, atol=1e-4, rtol=1e-4), "no-mask fused kernel mismatch"

    print("KERNEL_OK")
</pallas_src>

<mosaic_0001>
module attributes {stable_mosaic.version = 11 : i64} {
  func.func @_second_masked_kernel(%arg0: i32, %arg1: i32, %arg2: memref<1x16x128xf32, #tpu.memory_space<vmem>>, %arg3: memref<1x16x128xf32, #tpu.memory_space<vmem>>, %arg4: memref<1x1x128xf32, #tpu.memory_space<vmem>>, %arg5: memref<1x16x1xi8, #tpu.memory_space<vmem>>, %arg6: memref<1x1x128xf32, #tpu.memory_space<vmem>>, %arg7: memref<1x1x128xf32, #tpu.memory_space<vmem>>, %arg8: memref<1x16x128xf32, #tpu.memory_space<vmem>>) attributes {dimension_semantics = [#tpu.dimension_semantics<parallel>, #tpu.dimension_semantics<parallel>], iteration_bounds = array<i64: 1, 2>, scalar_prefetch = 0 : i64, scratch_operands = 0 : i64, tpu.core_type = #tpu.core_type<tc>, window_params = [{transform_indices = @transform_0, window_bounds = array<i64: 1, 16, 128>}, {transform_indices = @transform_1, window_bounds = array<i64: 1, 16, 128>}, {transform_indices = @transform_2, window_bounds = array<i64: 1, 1, 128>}, {transform_indices = @transform_3, window_bounds = array<i64: 1, 16, 1>}, {pipeline_mode = #tpu.pipeline_mode<synchronous>, transform_indices = @transform_4, window_bounds = array<i64: 1, 1, 128>}, {pipeline_mode = #tpu.pipeline_mode<synchronous>, transform_indices = @transform_5, window_bounds = array<i64: 1, 1, 128>}, {transform_indices = @transform_6, window_bounds = array<i64: 1, 16, 128>}]} {
    %c0 = arith.constant 0 : index
    %c0_0 = arith.constant 0 : index
    %c0_1 = arith.constant 0 : index
    %0 = vector.load %arg2[%c0, %c0_0, %c0_1] : memref<1x16x128xf32, #tpu.memory_space<vmem>>, vector<1x16x128xf32>
    %c0_2 = arith.constant 0 : index
    %c0_3 = arith.constant 0 : index
    %c0_4 = arith.constant 0 : index
    %1 = vector.load %arg3[%c0_2, %c0_3, %c0_4] : memref<1x16x128xf32, #tpu.memory_space<vmem>>, vector<1x16x128xf32>
    %2 = arith.addf %0, %1 : vector<1x16x128xf32>
    %c0_5 = arith.constant 0 : index
    %c0_6 = arith.constant 0 : index
    %c0_7 = arith.constant 0 : index
    %3 = vector.load %arg4[%c0_5, %c0_6, %c0_7] : memref<1x1x128xf32, #tpu.memory_space<vmem>>, vector<1x1x128xf32>
    %c0_8 = arith.constant 0 : index
    %c0_9 = arith.constant 0 : index
    %c0_10 = arith.constant 0 : index
    %4 = vector.load %arg5[%c0_8, %c0_9, %c0_10] : memref<1x16x1xi8, #tpu.memory_space<vmem>>, vector<1x16x1xi8>
    %c0_i8 = arith.constant 0 : i8
    %5 = vector.broadcast %c0_i8 : i8 to vector<1x16x1xi8>
    %6 = arith.cmpi ne, %4, %5 : vector<1x16x1xi8>
    %cst = arith.constant 0.000000e+00 : f32
    %7 = vector.shape_cast %6 : vector<1x16x1xi1> to vector<1x16x1xi1>
    %8 = vector.broadcast %7 : vector<1x16x1xi1> to vector<1x16x128xi1>
    %9 = vector.shape_cast %3 : vector<1x1x128xf32> to vector<1x1x128xf32>
    %10 = vector.broadcast %9 : vector<1x1x128xf32> to vector<1x16x128xf32>
    %11 = vector.broadcast %cst : f32 to vector<1x16x128xf32>
    %12 = arith.select %8, %10, %11 : vector<1x16x128xi1>, vector<1x16x128xf32>
    %13 = arith.addf %2, %12 : vector<1x16x128xf32>
    %cst_11 = arith.constant dense<0.000000e+00> : vector<1x16xf32>
    %14 = vector.multi_reduction <add>, %13, %cst_11 [2] : vector<1x16x128xf32> to vector<1x16xf32>
    %15 = vector.shape_cast %14 : vector<1x16xf32> to vector<1x16x1xf32>
    %cst_12 = arith.constant 1.280000e+02 : f32
    %16 = vector.broadcast %cst_12 : f32 to vector<1x16x1xf32>
    %17 = arith.divf %15, %16 : vector<1x16x1xf32>
    %18 = vector.broadcast %17 : vector<1x16x1xf32> to vector<1x16x128xf32>
    %19 = arith.subf %13, %18 : vector<1x16x128xf32>
    %20 = arith.mulf %19, %19 : vector<1x16x128xf32>
    %cst_13 = arith.constant dense<0.000000e+00> : vector<1x16xf32>
    %21 = vector.multi_reduction <add>, %20, %cst_13 [2] : vector<1x16x128xf32> to vector<1x16xf32>
    %22 = vector.shape_cast %21 : vector<1x16xf32> to vector<1x16x1xf32>
    %cst_14 = arith.constant 1.280000e+02 : f32
    %23 = vector.broadcast %cst_14 : f32 to vector<1x16x1xf32>
    %24 = arith.divf %22, %23 : vector<1x16x1xf32>
    %25 = vector.broadcast %17 : vector<1x16x1xf32> to vector<1x16x128xf32>
    %26 = arith.subf %13, %25 : vector<1x16x128xf32>
    %cst_15 = arith.constant 9.99999974E-6 : f32
    %27 = vector.broadcast %cst_15 : f32 to vector<1x16x1xf32>
    %28 = arith.addf %24, %27 : vector<1x16x1xf32>
    %29 = math.rsqrt %28 : vector<1x16x1xf32>
    %30 = vector.broadcast %29 : vector<1x16x1xf32> to vector<1x16x128xf32>
    %31 = arith.mulf %26, %30 : vector<1x16x128xf32>
    %c0_16 = arith.constant 0 : index
    %c0_17 = arith.constant 0 : index
    %c0_18 = arith.constant 0 : index
    %32 = vector.load %arg6[%c0_16, %c0_17, %c0_18] : memref<1x1x128xf32, #tpu.memory_space<vmem>>, vector<1x1x128xf32>
    %33 = vector.broadcast %32 : vector<1x1x128xf32> to vector<1x16x128xf32>
    %34 = arith.mulf %31, %33 : vector<1x16x128xf32>
    %c0_19 = arith.constant 0 : index
    %c0_20 = arith.constant 0 : index
    %c0_21 = arith.constant 0 : index
    %35 = vector.load %arg7[%c0_19, %c0_20, %c0_21] : memref<1x1x128xf32, #tpu.memory_space<vmem>>, vector<1x1x128xf32>
    %36 = vector.broadcast %35 : vector<1x1x128xf32> to vector<1x16x128xf32>
    %37 = arith.addf %34, %36 : vector<1x16x128xf32>
    %c0_22 = arith.constant 0 : index
    %c0_23 = arith.constant 0 : index
    %c0_24 = arith.constant 0 : index
    %38 = vector.load %arg8[%c0_22, %c0_23, %c0_24] : memref<1x16x128xf32, #tpu.memory_space<vmem>>, vector<1x16x128xf32>
    tpu.vector_store %arg8[%c0_22, %c0_23, %c0_24], %37 {strides = array<i32>} : memref<1x16x128xf32, #tpu.memory_space<vmem>>, vector<1x16x128xf32>,
    return
  }
  func.func @transform_0(%arg0: i32, %arg1: i32) -> (i32, i32, i32) {
    %c0_i32 = arith.constant 0 : i32
    %c0_i32_0 = arith.constant 0 : i32
    return %arg1, %arg0, %c0_i32 : i32, i32, i32
  }
  func.func @transform_1(%arg0: i32, %arg1: i32) -> (i32, i32, i32) {
    %c0_i32 = arith.constant 0 : i32
    %c0_i32_0 = arith.constant 0 : i32
    %c0_i32_1 = arith.constant 0 : i32
    return %c0_i32, %arg0, %c0_i32_0 : i32, i32, i32
  }
  func.func @transform_2(%arg0: i32, %arg1: i32) -> (i32, i32, i32) {
    %c0_i32 = arith.constant 0 : i32
    %c0_i32_0 = arith.constant 0 : i32
    %c0_i32_1 = arith.constant 0 : i32
    return %arg1, %c0_i32, %c0_i32_0 : i32, i32, i32
  }
  func.func @transform_3(%arg0: i32, %arg1: i32) -> (i32, i32, i32) {
    %c0_i32 = arith.constant 0 : i32
    %c0_i32_0 = arith.constant 0 : i32
    return %arg1, %arg0, %c0_i32 : i32, i32, i32
  }
  func.func @transform_4(%arg0: i32, %arg1: i32) -> (i32, i32, i32) {
    %c0_i32 = arith.constant 0 : i32
    %c0_i32_0 = arith.constant 0 : i32
    %c0_i32_1 = arith.constant 0 : i32
    %c0_i32_2 = arith.constant 0 : i32
    return %c0_i32, %c0_i32_0, %c0_i32_1 : i32, i32, i32
  }
  func.func @transform_5(%arg0: i32, %arg1: i32) -> (i32, i32, i32) {
    %c0_i32 = arith.constant 0 : i32
    %c0_i32_0 = arith.constant 0 : i32
    %c0_i32_1 = arith.constant 0 : i32
    %c0_i32_2 = arith.constant 0 : i32
    return %c0_i32, %c0_i32_0, %c0_i32_1 : i32, i32, i32
  }
  func.func @transform_6(%arg0: i32, %arg1: i32) -> (i32, i32, i32) {
    %c0_i32 = arith.constant 0 : i32
    %c0_i32_0 = arith.constant 0 : i32
    return %arg1, %arg0, %c0_i32 : i32, i32, i32
  }
}

</mosaic_0001>

<bundles_post_ra>
// kernel: tpu_custom_call.1
= control target key start
LH: loop header
LB: loop body
LE: loop exit
PB: predicated region body
PF: predicated region fallthrough
CT: control target
= control target key end

     0   :  { %11 = vsyncpa [#allocation3], 0  ;;  %s1132_s0 = inlined_call_operand.hbm [shape: f32[2,16,128], index: 0, kind: input, shape index: {}]   ;;  %s1133_s1 = inlined_call_operand.hbm [shape: f32[1,16,128], index: 1, kind: input, shape index: {}]   ;;  %s1134_s2 = inlined_call_operand.vmem [shape: f32[2,1,128], index: 2, kind: input, shape index: {}]   ;;  %s1135_s3 = inlined_call_operand.vmem [shape: s8[2,16,1], index: 3, kind: input, shape index: {}]   ;;  %s1136_s4 = inlined_call_operand.vmem [shape: f32[1,1,128], index: 4, kind: input, shape index: {}]   ;;  %s1137_s5 = inlined_call_operand.vmem [shape: f32[1,1,128], index: 5, kind: input, shape index: {}]   ;;  %s1138_s6 = inlined_call_operand.hbm [shape: f32[2,16,128], index: 6, kind: output, shape index: {}]  }
   0x1   :  { %13 = vsyncpa [#allocation3 + $0x1], 0 }
   0x2   :  { %14 = vsyncpa [#allocation6], 0 }
   0x3   :  { %15 = vsyncpa [#allocation4], 0 }
   0x4   :  { %17 = vsyncpa [#allocation4 + $0x1], 0  ;;  %s885_s21 = smov 0   ;;  %s887_s22 = smov 0  }
   0x5   :  { %s889_s23 = smov 0   ;;  %s891_s24 = smov 0  }
   0x6   :  { %s893_s25 = smov 0   ;;  %s895_s26 = smov 0  }
   0x7 LB: > { %s588_s27 = sadd.s32 4294967295, %s840_s26   ;;  %s589_s28 = sadd.s32 4294967294, %s840_s26   ;;  %s840_s26 = sphi %s895_s26, %s23_s26   ;;  %s836_s25 = sphi %s893_s25, %s1166_s25   ;;  %s832_s24 = sphi %s891_s24, %s1165_s24   ;;  %s828_s23 = sphi %s889_s23, %s1164_s23   ;;  %s824_s22 = sphi %s887_s22, %s1163_s22   ;;  %s820_s21 = sphi %s885_s21, %s1162_s21  }
   0x8   : > { %p57_p0 = scmp.ne.s32.totalorder %s824_s22, %s820_s21  ;;  %p919_p1 = scmp.eq.s32.totalorder %s588_s27, 0 }
   0x9   : > { %p923_p2 = scmp.eq.s32.totalorder %s588_s27, 1  ;;  %p211_p3 = scmp.eq.s32.totalorder %s589_s28, 1 }
   0xa   : > { %s1145_s29 = scalar_select %p919_p1, 1, 0 }
   0xb   : > { %s1146_s30 = scalar_select %p923_p2, 1, 0 }
   0xc   : > { %p929_p4 = por %p919_p1, %p57_p0  ;;  %p590_p5 = scmp.ge.s32.totalorder %s840_s26, 1 }
   0xd   : > { %p934_p6 = por %p211_p3, %p57_p0  ;;  %p218_p7 = scmp.lt.s32.totalorder %s840_s26, 3 }
   0xe   : > { %s1147_s7 = scalar_select %p929_p4, 1, 0 }
   0xf   : > { %s1148_s8 = scalar_select %p934_p6, 1, 0 }
  0x10   : > { %p939_p8 = pnand %p590_p5, %p218_p7  ;;  %s842_s10 = smov [#allocation5]  }
  0x11   : > { %s233_s11 = sshll.u32 %s842_s10, 4  ;;  %s32_s13 = sadd.s32 1, %s836_s25  ;;  %s234_s11 = int_to_ptr.vmem [resolvable:$true] %s233_s11 }
  0x12   : > { %s1149_s9 = scalar_select %p939_p8, 1, 0 }
  0x13   : > { %p621_p9 = pneg %p939_p8  ;;  %s696_s16 = scalar_lea.hbm %s1133_s1, 256 }
  0x14   : > { %p697_p12 = scmp.ne.s32.totalorder %s1133_s1, %s696_s16  ;;  %p703_p5 = scmp.lt.u32.totalorder %s696_s16, %s1133_s1 }
  0x15   : > { %p948_p11 = pnand %p621_p9, %p919_p1 }
  0x17   : > { %p698_p13 = pneg %p948_p11 }
  0x19   : > { %p699_p0 = pnand %p698_p13, %p697_p12 }
  0x1b   : > { %p700_p3 = pneg %p699_p0 }
  0x1d   : > { %p705_p7 = pnand %p703_p5, %p700_p3 }
  0x1f   : > { %708 = shalt.err (!%p705_p7)
}
  0x20   : > { %s709_s27 = scalar_lea.vmem %s234_s11, 256  ;;  %p717_p1 = scmp.lt.s32.totalorder %s234_s11, %s234_s11 }
  0x21   : > { %p710_p9 = scmp.ne.s32.totalorder %s234_s11, %s709_s27  ;;  %p718_p4 = scmp.lt.s32.totalorder %s709_s27, %s709_s27 }
  0x23   : > { %p712_p10 = pnand %p710_p9, %p698_p13  ;;  %p719_p8 = por %p718_p4, %p717_p1 }
  0x25   : > { %p713_p6 = pneg %p712_p10 }
  0x27   : > { %p720_p2 = pnand %p719_p8, %p713_p6 }
  0x29   : > { %723 = shalt.err (!%p720_p2)
}
  0x2a   : > { %s1143_s28 = smov 128   ;;  %s1144_s10 = smov 8  }
  0x2b   : > { %624 = dma.hbm_to_vmem [thread:$0]  (!%p948_p11), %s1133_s1, 256, %s234_s11, [#allocation6], %s1143_s28, %s1143_s28, %s1144_s10  }
  0x2c   : > { %p33_p1 = scmp.ge.s32.totalorder %s32_s13, 2  ;;  %s44_s16 = sadd.s32 1, %s828_s23 }
  0x2d   : > { %p51_p2 = scmp.ne.s32.totalorder %s828_s23, %s824_s22  ;;  %p52_p4 = scmp.eq.s32.totalorder %s840_s26, 0 }
  0x2e   : > { %s1168_s13 = smov (%p33_p1, %s32_s13), 0  ;;  %p1152_p8 = scmp.ne.s32.totalorder %s1146_s30, 0 }
  0x2f   : > { %p978_p6 = por %p52_p4, %p51_p2  ;;  %s39_s18 = ssub.s32 %s836_s25, %s1168_s13 }
  0x30   : > { %p984_p10 = por %p1152_p8, %p51_p2  ;;  %p634_p12 = scmp.lt.s32.totalorder %s840_s26, 2 }
  0x31   : > { %p42_p11 = scmp.eq.s32.totalorder %s39_s18, 0  ;;  %s253_s11 = sand.u32 1, %s828_s23  }
  0x32   : > { %s593_s19 = sshll.u32 %s253_s11, 4  ;;  %s610_s27 = sshll.u32 %s836_s25, 8 }
  0x33   : > { %s993_s20 = scalar_select %p42_p11, %s828_s23, %s44_s16  }
  0x34   : > { %s999_s28 = scalar_lea.hbm %s1132_s0, %s610_s27  ;;  %s257_s30 = scalar_lea.vmem [#allocation2], %s593_s19 }
  0x35   : > { %s266_s10 = sshll.u32 %s257_s30, 4  ;;  %p1005_p13 = pnand %p634_p12, %p978_p6  ;;  %s1001_s10 = int_to_ptr.vmem [resolvable:$true] %s266_s10 }
  0x36   : > { %s1009_s16 = scalar_lea.sflag [#allocation3], %s253_s11  ;;  %s724_s14 = scalar_lea.hbm %s999_s28, 256 }
  0x37   : > { %p725_p0 = scmp.ne.s32.totalorder %s999_s28, %s724_s14  ;;  %p726_p3 = pneg %p1005_p13 }
  0x38   : > { %s729_s17 = scalar_lea.hbm %s1132_s0, 512  ;;  %p730_p9 = scmp.lt.u32.totalorder %s999_s28, %s1132_s0 }
  0x39   : > { %p727_p5 = pnand %p726_p3, %p725_p0  ;;  %p731_p1 = scmp.lt.u32.totalorder %s729_s17, %s724_s14 }
  0x3a   : > { %p733_p4 = scmp.lt.u32.totalorder %s724_s14, %s999_s28 }
  0x3b   : > { %p728_p7 = pneg %p727_p5  ;;  %p732_p2 = por %p731_p1, %p730_p9 }
  0x3d   : > { %p734_p6 = por %p733_p4, %p732_p2 }
  0x3f   : > { %p735_p8 = pnand %p734_p6, %p728_p7 }
  0x41   : > { %738 = shalt.err (!%p735_p8)
}
  0x42   : > { %s739_s11 = scalar_lea.vmem %s1001_s10, 256  ;;  %s845_s19 = smov [#allocation2]  }
  0x43   : > { %p740_p12 = scmp.ne.s32.totalorder %s1001_s10, %s739_s11  ;;  %s744_s27 = sshll.u32 %s845_s19, 4  ;;  %s745_s27 = int_to_ptr.vmem [resolvable:$false] %s744_s27 }
  0x44   : > { %s746_s15 = scalar_lea.vmem %s745_s27, 512  ;;  %p747_p5 = scmp.lt.s32.totalorder %s1001_s10, %s745_s27 }
  0x45   : > { %p742_p11 = pnand %p740_p12, %p726_p3  ;;  %p748_p9 = scmp.lt.s32.totalorder %s746_s15, %s739_s11 }
  0x47   : > { %p743_p0 = pneg %p742_p11  ;;  %p749_p1 = por %p748_p9, %p747_p5 }
  0x49   : > { %p750_p2 = pnand %p749_p1, %p743_p0 }
  0x4b   : > { %753 = shalt.err (!%p750_p2)
}
  0x4c   : > { %s1155_s14 = smov 8   ;;  %s1156_s17 = smov 128  }
  0x4d   : > { %628 = dma.hbm_to_vmem [thread:$0]  (!%p1005_p13), %s999_s28, 256, %s1001_s10, %s1009_s16, %s1156_s17, %s1156_s17, %s1155_s14  }
  0x4e   : > { %p1157_p3 = scmp.ne.s32.totalorder %s1149_s9, 0 }
  0x4f   : > { %s1043_s30 = sand.u32 (!%p1157_p3), 1, %s824_s22   ;;  %p1158_p7 = scmp.ne.s32.totalorder (!%p1157_p3), %s1147_s7, 0 }
  0x50   : > { %297 = sbr.rel (%p1157_p3) target bundleno = 566 (0x236), region = 44  ;;  %s597_s11 = sshll.u32 (!%p1157_p3), %s1043_s30, 4 }
  0x51   : > { %s300_s19 = scalar_lea.sflag (!%p1157_p3), [#allocation3], %s1043_s30  ;;  %s1049_s18 = scalar_lea.vmem (!%p1157_p3), [#allocation2], %s597_s11 }
  0x57   : > { %807 = dma.done.wait (%p1158_p7), %s300_s19, 256  }
  0x58   : > { %809 = vsyncadd (%p1158_p7), %s300_s19, 4294967040  ;;  %p1159_p13 = scmp.ne.s32.totalorder %s1145_s29, 0 }
  0x5a   : > { %811 = dma.done.wait (%p1159_p13), [#allocation6], 256  }
  0x5b   : > { %813 = vsyncadd (%p1159_p13), [#allocation6], 4294967040  ;;  %p350_p4 = scmp.lt.s32.totalorder %s832_s24, 1  ;;  %v846_v0 = vmov 0   ;;  %v366_v9 = vld [vmem:[%s1049_s18] sm:$0xff]  ;;  %v367_v14 = vld [vmem:[%s1049_s18 + $0x8] sm:$0xff] }
  0x5c   : > { %691 = vset.pattern.permute.xlu0 %v846_v0  ;;  %v368_v10 = vld [vmem:[#allocation5] sm:$0xff]  ;;  %v369_v15 = vld [vmem:[#allocation5 + $0x8] sm:$0xff]  ;;  %s447_s7 = scalar_lea.sflag [#allocation4], %s1043_s30 }
  0x5d   : > { %s351_s9 = scalar_select %p350_p4, %s832_s24, 1  ;;  %v370_v12 = vadd.f32 %v368_v10, %v366_v9  ;;  %v371_v18 = vadd.f32 %v369_v15, %v367_v14  ;;  %v603_v37 = vld [vmem:[%s1136_s4] ss:$0 sm:$0xff] }
  0x5e   : > { %v604_v39 = vld [vmem:[%s1137_s5] ss:$0 sm:$0xff] }
  0x5f   : > { %s611_s28 = sshll.u32 %s351_s9, 2  ;;  %s352_s15 = scalar_lea.vmem %s1134_s2, %s351_s9 }
  0x60   : > { %s361_s27 = scalar_lea.vmem %s1135_s3, %s611_s28  ;;  %v602_v11 = vld [vmem:[%s352_s15] ss:$0 sm:$0xff]  ;;  %s612_s9 = sshll.u32 %s832_s24, 8 }
  0x61   : > { %v373_v1 = vld [vmem:[%s361_s27] sm:$0x3]  ;;  %v374_v2 = vld [vmem:[%s361_s27 + $0x2] sm:$0x3]  ;;  %s347_s28 = scalar_lea.vmem [#allocation7], %s597_s11  ;;  %s1081_s29 = scalar_lea.hbm %s1138_s6, %s612_s9 }
  0x62   : > { %vm375_vm0 = vnez %v373_v1  ;;  %vm376_vm1 = vnez %v374_v2  ;;  %s462_s10 = sshll.u32 %s347_s28, 4  ;;  %s847_s24 = smov [#allocation7]   ;;  %s1083_s10 = int_to_ptr.vmem [resolvable:$true] %s462_s10 }
  0x63   : > { %v377_v3 = vsel %vm375_vm0, 16843009, %v846_v0  ;;  %v378_v4 = vsel %vm376_vm1, 16843009, %v846_v0  ;;  %s754_s15 = scalar_lea.vmem %s1083_s10, 256  ;;  %s758_s11 = sshll.u32 %s847_s24, 4  ;;  %s759_s11 = int_to_ptr.vmem [resolvable:$false] %s758_s11 }
  0x64   : > { %v379_v5 = vunpack.c.0.s8 %v377_v3  ;;  %v380_v6 = vunpack.c.0.s8 %v378_v4  ;;  %p755_p6 = scmp.ne.s32.totalorder %s1083_s10, %s754_s15  ;;  %s760_s14 = scalar_lea.vmem %s759_s11, 512 }
  0x65   : > { %p761_p11 = scmp.lt.s32.totalorder %s1083_s10, %s759_s11  ;;  %p762_p0 = scmp.lt.s32.totalorder %s760_s14, %s754_s15 }
  0x66   : > { %vm381_vm2 = vcmp.ne.s32.totalorder %v379_v5, 0  ;;  %vm382_vm3 = vcmp.ne.s32.totalorder %v380_v6, 0  ;;  %p756_p8 = pnand %p755_p6, %p984_p10 }
  0x67   : > { %v383_v7 = vsel %vm381_vm2, 1, %v846_v0  ;;  %v384_v8 = vsel %vm382_vm3, 1, %v846_v0  ;;  %p763_p5 = por %p762_p0, %p761_p11 }
  0x68   : > { %386 = vperm.xlu0 %691, %v383_v7   ;;  %p757_p12 = pneg %p756_p8 }
  0x6a   : > { %p764_p9 = pnand %p763_p5, %p757_p12 }
  0x6c   : > { %389 = vperm.xlu0 %691, %v384_v8  }
  0xe7   : > { %v387_v13 = vpop.permute.xlu0 %386 }
  0xe8   : > { %vm391_vm4 = vcmp.eq.s32.totalorder %v387_v13, 1 }
  0xe9   : > { %v399_v16 = vsel %vm391_vm4, %v602_v11, 0.0 }
  0xea   : > { %v401_v17 = vadd.f32 %v399_v16, %v370_v12 }
  0xeb   : > { %v390_v19 = vpop.permute.xlu0 %389 }
  0xec   : > { %vm392_vm5 = vcmp.eq.s32.totalorder %v390_v19, 1  ;;  %403 = vadd.xlane.f32.xlu1 %v401_v17 }
  0xed   : > { %v400_v20 = vsel %vm392_vm5, %v602_v11, 0.0 }
  0xee   : > { %v402_v21 = vadd.f32 %v400_v20, %v371_v18 }
  0xf0   : > { %405 = vadd.xlane.f32.xlu1 %v402_v21 }
 0x179   : > { %v404_v22 = vpop.xlane.xlu1 %403 }
 0x17a   : > { %v408_v23 = vmul.f32 0.0078125, %v404_v22 }
 0x17c   : > { %v410_v24 = vsub.f32 %v401_v17, %v408_v23 }
 0x17d   : > { %v406_v25 = vpop.xlane.xlu1 %405 }
 0x17e   : > { %v409_v26 = vmul.f32 0.0078125, %v406_v25  ;;  %v412_v27 = vmul.f32 %v410_v24, %v410_v24 }
 0x180   : > { %v411_v28 = vsub.f32 %v402_v21, %v409_v26  ;;  %414 = vadd.xlane.f32.xlu0 %v412_v27 }
 0x182   : > { %v413_v29 = vmul.f32 %v411_v28, %v411_v28 }
 0x184   : > { %416 = vadd.xlane.f32.xlu1 %v413_v29 }
 0x20d   : > { %v415_v30 = vpop.xlane.xlu0 %414 }
 0x20e   : > { %v418_v31 = vmul.f32 0.0078125, %v415_v30 }
 0x210   : > { %v420_v32 = vadd.f32 1e-05, %v418_v31 }
 0x211   : > { %v417_v33 = vpop.xlane.xlu1 %416 }
 0x212   : > { %692 = vrsqrt.f32 %v420_v32  ;;  %v419_v34 = vmul.f32 0.0078125, %v417_v33 }
 0x214   : > { %v421_v35 = vadd.f32 1e-05, %v419_v34 }
 0x216   : > { %694 = vrsqrt.f32 %v421_v35 }
 0x21c   : > { %v693_v36 = vpop.eup %692 }
 0x21d   : > { %v424_v38 = vmul.f32 %v693_v36, %v410_v24 }
 0x21f   : > { %v433_v40 = vmul.f32 %v603_v37, %v424_v38 }
 0x220   : > { %v695_v41 = vpop.eup %694 }
 0x221   : > { %v442_v42 = vadd.f32 %v604_v39, %v433_v40  ;;  %v425_v43 = vmul.f32 %v695_v41, %v411_v28 }
 0x223   : > { %v434_v44 = vmul.f32 %v603_v37, %v425_v43  ;;  %444 = vst [vmem:[%s347_s28] sm:$0xff] %v442_v42 }
 0x225   : > { %v443_v45 = vadd.f32 %v604_v39, %v434_v44 }
 0x227   : > { %445 = vst [vmem:[%s347_s28 + $0x8] sm:$0xff] %v443_v45 }
 0x228   : > { %767 = shalt.err (!%p764_p9)
}
 0x229   : > { %s768_s17 = scalar_lea.hbm %s1081_s29, 256  ;;  %s772_s9 = scalar_lea.hbm %s1138_s6, 512 }
 0x22a   : > { %p769_p1 = scmp.ne.s32.totalorder %s1081_s29, %s768_s17  ;;  %p773_p7 = scmp.lt.u32.totalorder %s1081_s29, %s1138_s6 }
 0x22b   : > { %p774_p13 = scmp.lt.u32.totalorder %s772_s9, %s768_s17  ;;  %p776_p6 = scmp.lt.u32.totalorder %s768_s17, %s1081_s29 }
 0x22c   : > { %p770_p2 = pnand %p769_p1, %p984_p10 }
 0x22d   : > { %p775_p4 = por %p774_p13, %p773_p7 }
 0x22e   : > { %p771_p3 = pneg %p770_p2 }
 0x22f   : > { %p777_p8 = por %p776_p6, %p775_p4 }
 0x231   : > { %p778_p12 = pnand %p777_p8, %p771_p3 }
 0x233   : > { %781 = shalt.err (!%p778_p12)
}
 0x234   : > { %s848_s27 = smov 128   ;;  %s849_s15 = smov 8  }
 0x235   : > { %619 = dma.vmem_to_hbm [thread:$0]  (%p984_p10), %s1083_s10, 256, %s1081_s29, %s447_s7, %s848_s27, %s848_s27, %s849_s15  }
 0x236 PF: > { %s477_s24 = sand.u32 1, %s820_s21   ;;  %p1160_p11 = scmp.ne.s32.totalorder %s1148_s8, 0 }
 0x237   : > { %p1161_p0 = scmp.ge.s32.totalorder %s840_s26, 2  ;;  %s478_s11 = scalar_lea.sflag [#allocation4], %s477_s24 }
 0x239   : > { %p630_p5 = pnand %p1161_p0, %p1160_p11 }
 0x23b   : > { %815 = dma.done.wait (!%p630_p5), %s478_s11, 256  }
 0x23c   : > { %817 = vsyncadd (!%p630_p5), %s478_s11, 4294967040  ;;  %s23_s26 = sadd.s32 1, %s840_s26   ;;  %s1162_s21 = smov %s824_s22 }
 0x23d   : > { %p20_p9 = scmp.ge.s32.totalorder %s23_s26, 4   ;;  %s1163_s22 = smov %s828_s23 }
 0x23e   : > { %s1164_s23 = smov %s993_s20  ;;  %s1165_s24 = smov %s836_s25 }
 0x23f   : > { %s1166_s25 = smov %s1168_s13  ;;  %22 = sbr.rel (!%p20_p9) target bundleno = 7 (0x7), region = 100 }
 0x246   :  { %483 = vsyncpa [#allocation3], 1 }
 0x247   :  { %485 = vsyncpa [#allocation3 + $0x1], 1 }
 0x248   :  { %486 = vsyncpa [#allocation6], 1 }
 0x249   :  { %487 = vsyncpa [#allocation4], 1 }
 0x24a   :  { %489 = vsyncpa [#allocation4 + $0x1], 1 }

</bundles_post_ra>
